<compile_context>
chip_gen: v7x
topology: tpu7x:2x2x1
jax: 0.10.0
libtpu: 0.0.40
codegen_flags: <defaults>
</compile_context>

<pallas_src>
import functools

import jax
import jax.numpy as jnp
from jax.experimental import pallas as pl
from jax.experimental.pallas import tpu as pltpu

OBS_RAW_DIM = 12           # raw obs dim; obs[:, :11] + obs[:, 1:] needs D_raw - 1 == 11
OBS_DIM = 11               # trunk input dim (forced to 11 in __init__)
ACTION_DIM = 6             # halfcheetah action dim
PAD_A = 8                  # sublane-aligned band width for mu / std / tanh(mu)
OUT_ROWS = 3 * PAD_A       # fused output slab: rows 0-7 mu | 8-15 std | 16-23 tanh(mu)
HIDDEN_DIM = 32
ADAPTER_DIM = HIDDEN_DIM // 4
LOG_STD_MIN, LOG_STD_MAX = -5.0, 2.0

# Default batch tile (lane axis). 8192 cols -> (12 + 24) * 8192 * 4B ~= 1.1 MiB of IO
# per step (double-buffered ~2.3 MiB) plus ~4-5 MiB of [32, 8192] f32 activations:
# well under all VMEM limits while amortizing the ~0.35 us per-step pipeline cost.
DEFAULT_BLOCK_B = 8192


def actor_kernel(obs_ref,             # raw obs [OBS_RAW_DIM, TB] (shift folded into w0)
                 w0_ref, b0_ref,      # trunk[0]:  Linear(12->H, folded)  [H, 12],  [H, 1]
                 wa1_ref, ba1_ref,    # adapter dn: Linear(H, H/4)        [H/4, H], [H/4, 1]
                 wa2_ref, ba2_ref,    # adapter up: Linear(H/4, H)        [H, H/4], [H, 1]
                 w1_ref, b1_ref,      # Linear(H, H)                      [H, H],   [H, 1]
                 w2_ref, b2_ref,      # head (padded): Linear(H, 16)      [16, H],  [16, 1]
                 out_ref):            # fused [OUT_ROWS, TB]: mu | std | tanh(mu), 8-row bands
    x = obs_ref[...]                                       # [12, TB]

    # trunk[0:2]: Linear + ReLU  (obs shift-add already folded into w0)
    h = jnp.maximum(
        jnp.dot(w0_ref[...], x, preferred_element_type=jnp.float32) + b0_ref[...], 0.0)

    # FineAdapter(hidden_dim)
    # TODO(synk): FineAdapter is not defined in the reference source; implemented as the
    # standard residual bottleneck adapter h + W_up(relu(W_down(h))).
    z = jnp.maximum(
        jnp.dot(wa1_ref[...], h, preferred_element_type=jnp.float32) + ba1_ref[...], 0.0)
    h = h + jnp.dot(wa2_ref[...], z, preferred_element_type=jnp.float32) + ba2_ref[...]

    # trunk[2:]: Linear + ReLU + Linear (head padded to 16 rows: mu 0-7, log_std 8-15)
    h = jnp.maximum(
        jnp.dot(w1_ref[...], h, preferred_element_type=jnp.float32) + b1_ref[...], 0.0)
    out = jnp.dot(w2_ref[...], h, preferred_element_type=jnp.float32) + b2_ref[...]  # [16, TB]

    # chunk(2) on an 8-sublane boundary -> free views, no retiling
    mu = out[:PAD_A, :]
    log_std = jnp.tanh(out[PAD_A:, :])
    log_std = LOG_STD_MIN + 0.5 * (LOG_STD_MAX - LOG_STD_MIN) * (log_std + 1.0)

    # Three aligned 8-row band stores into one lane-dense output slab.
    out_ref[0:PAD_A, :] = mu
    out_ref[PAD_A:2 * PAD_A, :] = jnp.exp(log_std)
    out_ref[2 * PAD_A:3 * PAD_A, :] = jnp.tanh(mu)


def _round_up(x, m):
    return (x + m - 1) // m * m


def prepare_params(params):
    """One-time param prep (PyTorch-layout -> kernel layout).

    * Folds obs' = obs[:, :11] + obs[:, 1:] into the first weight: W0' = w0 @ A,
      with A[i, i] = A[i, i+1] = 1 (A: [11, 12]).
    * Pads the output head to 16 rows so the mu / log_std chunk is 8-sublane aligned
      (mu in rows 0-5, log_std in rows 8-13; padded rows are zero and never read).
    """
    w0, b0, wa1, ba1, wa2, ba2, w1, b1, w2, b2 = params

    shift = (jnp.eye(OBS_DIM, OBS_RAW_DIM, k=0, dtype=jnp.float32)
             + jnp.eye(OBS_DIM, OBS_RAW_DIM, k=1, dtype=jnp.float32))   # [11, 12]
    w0f = w0 @ shift                                                    # [H, 12]

    w2p = jnp.zeros((2 * PAD_A, HIDDEN_DIM), jnp.float32)
    w2p = w2p.at[0:ACTION_DIM].set(w2[0:ACTION_DIM])
    w2p = w2p.at[PAD_A:PAD_A + ACTION_DIM].set(w2[ACTION_DIM:])
    b2p = jnp.zeros((2 * PAD_A, 1), jnp.float32)
    b2p = b2p.at[0:ACTION_DIM].set(b2[0:ACTION_DIM])
    b2p = b2p.at[PAD_A:PAD_A + ACTION_DIM].set(b2[ACTION_DIM:])

    return (w0f, b0, wa1, ba1, wa2, ba2, w1, b1, w2p, b2p)


@functools.partial(jax.jit, static_argnames=("block_b",))
def diag_gaussian_actor_forward(obs, prepped_params, *, block_b=DEFAULT_BLOCK_B):
    """Whole actor MLP head in one Pallas call, tiled over the batch.

    NOTE: at tiny serving batches (B ~ 2) the fixed pallas_call / DMA-descriptor
    overhead dominates the <10 kFLOP of work; batch many env steps per call for
    the kernel to pay off.
    """
    B, d_raw = obs.shape
    assert d_raw == OBS_RAW_DIM and OBS_RAW_DIM == OBS_DIM + 1, (
        "obs shift-add requires raw obs dim == OBS_DIM + 1 == 12")

    # Batch-on-lanes layout: one transpose in the wrapper, no padding pass (the
    # non-divisible tail block is handled by Pallas with a masked writeback).
    obs_t = jnp.asarray(obs, jnp.float32).T                # [OBS_RAW_DIM, B]

    # Lane-aligned batch tile, large enough to amortize per-step pipeline overhead,
    # capped so the grid has >= 2 steps when B allows (v7x: both TensorCores work).
    tb = min(block_b, max(128, _round_up(-(-B // 2), 128)))
    grid = (pl.cdiv(B, tb),)

    obs_spec = pl.BlockSpec((OBS_RAW_DIM, tb), lambda i: (0, i))
    # Constant index_map -> weights/biases are fetched once and stay VMEM-resident.
    param_specs = [pl.BlockSpec(p.shape, lambda i: (0, 0)) for p in prepped_params]
    out_spec = pl.BlockSpec((OUT_ROWS, tb), lambda i: (0, i))

    cost = pl.CostEstimate(
        flops=2 * B * (OBS_RAW_DIM * HIDDEN_DIM + HIDDEN_DIM * ADAPTER_DIM
                       + ADAPTER_DIM * HIDDEN_DIM + HIDDEN_DIM * HIDDEN_DIM
                       + HIDDEN_DIM * 2 * PAD_A),
        transcendentals=3 * PAD_A * B,
        bytes_accessed=4 * B * (OBS_RAW_DIM + OUT_ROWS),
    )

    out = pl.pallas_call(
        actor_kernel,
        out_shape=jax.ShapeDtypeStruct((OUT_ROWS, B), jnp.float32),
        grid=grid,
        in_specs=[obs_spec] + param_specs,
        out_specs=out_spec,
        compiler_params=pltpu.CompilerParams(
            dimension_semantics=("parallel",),             # v7x: shard tiles over 2 TCs
            vmem_limit_bytes=48 * 1024 * 1024),            # headroom for big tiles on v5e
        cost_estimate=cost,
    )(obs_t, *prepped_params)

    # Collapsed epilogue: one wide transpose of the fused slab, then cheap column slices.
    out_t = out.T                                          # [B, OUT_ROWS]
    mu = out_t[:, 0:ACTION_DIM]
    std = out_t[:, PAD_A:PAD_A + ACTION_DIM]
    mean = out_t[:, 2 * PAD_A:2 * PAD_A + ACTION_DIM]      # SquashedNormal.mean
    return mu, std, mean


def init_params(key):
    """PyTorch-native layouts: weights [out, in], biases [out, 1]."""
    ks = jax.random.split(key, 5)

    def linear(k, fan_in, fan_out):
        kw, kb = jax.random.split(k)
        lim = 1.0 / jnp.sqrt(jnp.float32(fan_in))
        w = jax.random.uniform(kw, (fan_out, fan_in), jnp.float32, -lim, lim)
        b = jax.random.uniform(kb, (fan_out, 1), jnp.float32, -lim, lim)
        return w, b

    w0, b0 = linear(ks[0], OBS_DIM, HIDDEN_DIM)
    wa1, ba1 = linear(ks[1], HIDDEN_DIM, ADAPTER_DIM)
    wa2, ba2 = linear(ks[2], ADAPTER_DIM, HIDDEN_DIM)
    w1, b1 = linear(ks[3], HIDDEN_DIM, HIDDEN_DIM)
    w2, b2 = linear(ks[4], HIDDEN_DIM, 2 * ACTION_DIM)
    return (w0, b0, wa1, ba1, wa2, ba2, w1, b1, w2, b2)


def reference_forward(obs, params):
    w0, b0, wa1, ba1, wa2, ba2, w1, b1, w2, b2 = params
    x = obs[:, :OBS_DIM] + obs[:, 1:OBS_RAW_DIM]
    h = jnp.maximum(x @ w0.T + b0.T, 0.0)
    z = jnp.maximum(h @ wa1.T + ba1.T, 0.0)
    h = h + z @ wa2.T + ba2.T
    h = jnp.maximum(h @ w1.T + b1.T, 0.0)
    out = h @ w2.T + b2.T
    mu, log_std = out[:, :ACTION_DIM], out[:, ACTION_DIM:]
    log_std = jnp.tanh(log_std)
    log_std = LOG_STD_MIN + 0.5 * (LOG_STD_MAX - LOG_STD_MIN) * (log_std + 1.0)
    std = jnp.exp(log_std)
    return mu, std, jnp.tanh(mu)


if __name__ == "__main__":
    key = jax.random.PRNGKey(0)
    k_obs, k_par = jax.random.split(key)
    params = init_params(k_par)
    prepped = prepare_params(params)

    # Small serving batch, a multi-step grid with a full tail tile, and a
    # non-128-multiple batch that exercises the masked partial tail block.
    for B, blk in ((2, DEFAULT_BLOCK_B), (384, 256), (1000, DEFAULT_BLOCK_B)):
        obs = jax.random.normal(jax.random.fold_in(k_obs, B), (B, OBS_RAW_DIM),
                                jnp.float32)
        mu, std, dist_mean = diag_gaussian_actor_forward(obs, prepped, block_b=blk)
        jax.block_until_ready((mu, std, dist_mean))

        mu_ref, std_ref, mean_ref = reference_forward(obs, params)
        assert jnp.allclose(mu, mu_ref, rtol=1e-4, atol=1e-5), f"mu mismatch B={B}"
        assert jnp.allclose(std, std_ref, rtol=1e-4, atol=1e-5), f"std mismatch B={B}"
        assert jnp.allclose(dist_mean, mean_ref, rtol=1e-4, atol=1e-5), f"mean mismatch B={B}"

    print("KERNEL_OK")
</pallas_src>

<mosaic_0001>
module attributes {stable_mosaic.version = 11 : i64} {
  func.func @actor_kernel(%arg0: i32, %arg1: memref<12x128xf32, #tpu.memory_space<vmem>>, %arg2: memref<32x12xf32, #tpu.memory_space<vmem>>, %arg3: memref<32x1xf32, #tpu.memory_space<vmem>>, %arg4: memref<8x32xf32, #tpu.memory_space<vmem>>, %arg5: memref<8x1xf32, #tpu.memory_space<vmem>>, %arg6: memref<32x8xf32, #tpu.memory_space<vmem>>, %arg7: memref<32x1xf32, #tpu.memory_space<vmem>>, %arg8: memref<32x32xf32, #tpu.memory_space<vmem>>, %arg9: memref<32x1xf32, #tpu.memory_space<vmem>>, %arg10: memref<16x32xf32, #tpu.memory_space<vmem>>, %arg11: memref<16x1xf32, #tpu.memory_space<vmem>>, %arg12: memref<24x128xf32, #tpu.memory_space<vmem>>) attributes {dimension_semantics = [#tpu.dimension_semantics<parallel>], iteration_bounds = array<i64: 1>, scalar_prefetch = 0 : i64, scratch_operands = 0 : i64, tpu.core_type = #tpu.core_type<tc>, window_params = [{transform_indices = @transform_0, window_bounds = array<i64: 12, 128>}, {pipeline_mode = #tpu.pipeline_mode<synchronous>, transform_indices = @transform_1, window_bounds = array<i64: 32, 12>}, {pipeline_mode = #tpu.pipeline_mode<synchronous>, transform_indices = @transform_2, window_bounds = array<i64: 32, 1>}, {pipeline_mode = #tpu.pipeline_mode<synchronous>, transform_indices = @transform_3, window_bounds = array<i64: 8, 32>}, {pipeline_mode = #tpu.pipeline_mode<synchronous>, transform_indices = @transform_4, window_bounds = array<i64: 8, 1>}, {pipeline_mode = #tpu.pipeline_mode<synchronous>, transform_indices = @transform_5, window_bounds = array<i64: 32, 8>}, {pipeline_mode = #tpu.pipeline_mode<synchronous>, transform_indices = @transform_6, window_bounds = array<i64: 32, 1>}, {pipeline_mode = #tpu.pipeline_mode<synchronous>, transform_indices = @transform_7, window_bounds = array<i64: 32, 32>}, {pipeline_mode = #tpu.pipeline_mode<synchronous>, transform_indices = @transform_8, window_bounds = array<i64: 32, 1>}, {pipeline_mode = #tpu.pipeline_mode<synchronous>, transform_indices = @transform_9, window_bounds = array<i64: 16, 32>}, {pipeline_mode = #tpu.pipeline_mode<synchronous>, transform_indices = @transform_10, window_bounds = array<i64: 16, 1>}, {transform_indices = @transform_11, window_bounds = array<i64: 24, 128>}]} {
    %c0 = arith.constant 0 : index
    %c0_0 = arith.constant 0 : index
    %0 = vector.load %arg1[%c0, %c0_0] : memref<12x128xf32, #tpu.memory_space<vmem>>, vector<12x128xf32>
    %c0_1 = arith.constant 0 : index
    %c0_2 = arith.constant 0 : index
    %1 = vector.load %arg2[%c0_1, %c0_2] : memref<32x12xf32, #tpu.memory_space<vmem>>, vector<32x12xf32>
    %cst = arith.constant dense<0.000000e+00> : vector<32x128xf32>
    %2 = tpu.matmul %1, %0, %cst {dimension_numbers = #tpu.dot_dimension_numbers<[1], [0], [0], [1], [0, 0, 1, 1], [], []>} : vector<32x12xf32>, vector<12x128xf32>, vector<32x128xf32> -> vector<32x128xf32>
    %c0_3 = arith.constant 0 : index
    %c0_4 = arith.constant 0 : index
    %3 = vector.load %arg3[%c0_3, %c0_4] : memref<32x1xf32, #tpu.memory_space<vmem>>, vector<32x1xf32>
    %4 = vector.broadcast %3 : vector<32x1xf32> to vector<32x128xf32>
    %5 = arith.addf %2, %4 : vector<32x128xf32>
    %cst_5 = arith.constant 0.000000e+00 : f32
    %6 = vector.broadcast %cst_5 : f32 to vector<32x128xf32>
    %7 = arith.maximumf %5, %6 : vector<32x128xf32>
    %c0_6 = arith.constant 0 : index
    %c0_7 = arith.constant 0 : index
    %8 = vector.load %arg4[%c0_6, %c0_7] : memref<8x32xf32, #tpu.memory_space<vmem>>, vector<8x32xf32>
    %cst_8 = arith.constant dense<0.000000e+00> : vector<8x128xf32>
    %9 = tpu.matmul %8, %7, %cst_8 {dimension_numbers = #tpu.dot_dimension_numbers<[1], [0], [0], [1], [0, 0, 1, 1], [], []>} : vector<8x32xf32>, vector<32x128xf32>, vector<8x128xf32> -> vector<8x128xf32>
    %c0_9 = arith.constant 0 : index
    %c0_10 = arith.constant 0 : index
    %10 = vector.load %arg5[%c0_9, %c0_10] : memref<8x1xf32, #tpu.memory_space<vmem>>, vector<8x1xf32>
    %11 = vector.broadcast %10 : vector<8x1xf32> to vector<8x128xf32>
    %12 = arith.addf %9, %11 : vector<8x128xf32>
    %cst_11 = arith.constant 0.000000e+00 : f32
    %13 = vector.broadcast %cst_11 : f32 to vector<8x128xf32>
    %14 = arith.maximumf %12, %13 : vector<8x128xf32>
    %c0_12 = arith.constant 0 : index
    %c0_13 = arith.constant 0 : index
    %15 = vector.load %arg6[%c0_12, %c0_13] : memref<32x8xf32, #tpu.memory_space<vmem>>, vector<32x8xf32>
    %cst_14 = arith.constant dense<0.000000e+00> : vector<32x128xf32>
    %16 = tpu.matmul %15, %14, %cst_14 {dimension_numbers = #tpu.dot_dimension_numbers<[1], [0], [0], [1], [0, 0, 1, 1], [], []>} : vector<32x8xf32>, vector<8x128xf32>, vector<32x128xf32> -> vector<32x128xf32>
    %17 = arith.addf %7, %16 : vector<32x128xf32>
    %c0_15 = arith.constant 0 : index
    %c0_16 = arith.constant 0 : index
    %18 = vector.load %arg7[%c0_15, %c0_16] : memref<32x1xf32, #tpu.memory_space<vmem>>, vector<32x1xf32>
    %19 = vector.broadcast %18 : vector<32x1xf32> to vector<32x128xf32>
    %20 = arith.addf %17, %19 : vector<32x128xf32>
    %c0_17 = arith.constant 0 : index
    %c0_18 = arith.constant 0 : index
    %21 = vector.load %arg8[%c0_17, %c0_18] : memref<32x32xf32, #tpu.memory_space<vmem>>, vector<32x32xf32>
    %cst_19 = arith.constant dense<0.000000e+00> : vector<32x128xf32>
    %22 = tpu.matmul %21, %20, %cst_19 {dimension_numbers = #tpu.dot_dimension_numbers<[1], [0], [0], [1], [0, 0, 1, 1], [], []>} : vector<32x32xf32>, vector<32x128xf32>, vector<32x128xf32> -> vector<32x128xf32>
    %c0_20 = arith.constant 0 : index
    %c0_21 = arith.constant 0 : index
    %23 = vector.load %arg9[%c0_20, %c0_21] : memref<32x1xf32, #tpu.memory_space<vmem>>, vector<32x1xf32>
    %24 = vector.broadcast %23 : vector<32x1xf32> to vector<32x128xf32>
    %25 = arith.addf %22, %24 : vector<32x128xf32>
    %cst_22 = arith.constant 0.000000e+00 : f32
    %26 = vector.broadcast %cst_22 : f32 to vector<32x128xf32>
    %27 = arith.maximumf %25, %26 : vector<32x128xf32>
    %c0_23 = arith.constant 0 : index
    %c0_24 = arith.constant 0 : index
    %28 = vector.load %arg10[%c0_23, %c0_24] : memref<16x32xf32, #tpu.memory_space<vmem>>, vector<16x32xf32>
    %cst_25 = arith.constant dense<0.000000e+00> : vector<16x128xf32>
    %29 = tpu.matmul %28, %27, %cst_25 {dimension_numbers = #tpu.dot_dimension_numbers<[1], [0], [0], [1], [0, 0, 1, 1], [], []>} : vector<16x32xf32>, vector<32x128xf32>, vector<16x128xf32> -> vector<16x128xf32>
    %c0_26 = arith.constant 0 : index
    %c0_27 = arith.constant 0 : index
    %30 = vector.load %arg11[%c0_26, %c0_27] : memref<16x1xf32, #tpu.memory_space<vmem>>, vector<16x1xf32>
    %31 = vector.broadcast %30 : vector<16x1xf32> to vector<16x128xf32>
    %32 = arith.addf %29, %31 : vector<16x128xf32>
    %33 = vector.extract_strided_slice %32 {offsets = [0, 0], sizes = [8, 128], strides = [1, 1]} : vector<16x128xf32> to vector<8x128xf32>
    %34 = vector.extract_strided_slice %32 {offsets = [8, 0], sizes = [8, 128], strides = [1, 1]} : vector<16x128xf32> to vector<8x128xf32>
    %35 = math.tanh %34 : vector<8x128xf32>
    %cst_28 = arith.constant 1.000000e+00 : f32
    %36 = vector.broadcast %cst_28 : f32 to vector<8x128xf32>
    %37 = arith.addf %35, %36 : vector<8x128xf32>
    %cst_29 = arith.constant 3.500000e+00 : f32
    %38 = vector.broadcast %cst_29 : f32 to vector<8x128xf32>
    %39 = arith.mulf %38, %37 : vector<8x128xf32>
    %cst_30 = arith.constant -5.000000e+00 : f32
    %40 = vector.broadcast %cst_30 : f32 to vector<8x128xf32>
    %41 = arith.addf %40, %39 : vector<8x128xf32>
    %c0_31 = arith.constant 0 : index
    %c0_32 = arith.constant 0 : index
    %42 = vector.load %arg12[%c0_31, %c0_32] : memref<24x128xf32, #tpu.memory_space<vmem>>, vector<8x128xf32>
    tpu.vector_store %arg12[%c0_31, %c0_32], %33 {strides = array<i32>} : memref<24x128xf32, #tpu.memory_space<vmem>>, vector<8x128xf32>,
    %43 = math.exp %41 : vector<8x128xf32>
    %c8 = arith.constant 8 : index
    %c0_33 = arith.constant 0 : index
    %44 = vector.load %arg12[%c8, %c0_33] : memref<24x128xf32, #tpu.memory_space<vmem>>, vector<8x128xf32>
    tpu.vector_store %arg12[%c8, %c0_33], %43 {strides = array<i32>} : memref<24x128xf32, #tpu.memory_space<vmem>>, vector<8x128xf32>,
    %45 = math.tanh %33 : vector<8x128xf32>
    %c16 = arith.constant 16 : index
    %c0_34 = arith.constant 0 : index
    %46 = vector.load %arg12[%c16, %c0_34] : memref<24x128xf32, #tpu.memory_space<vmem>>, vector<8x128xf32>
    tpu.vector_store %arg12[%c16, %c0_34], %45 {strides = array<i32>} : memref<24x128xf32, #tpu.memory_space<vmem>>, vector<8x128xf32>,
    return
  }
  func.func @transform_0(%arg0: i32) -> (i32, i32) {
    %c0_i32 = arith.constant 0 : i32
    %c0_i32_0 = arith.constant 0 : i32
    return %c0_i32, %arg0 : i32, i32
  }
  func.func @transform_1(%arg0: i32) -> (i32, i32) {
    %c0_i32 = arith.constant 0 : i32
    %c0_i32_0 = arith.constant 0 : i32
    %c0_i32_1 = arith.constant 0 : i32
    return %c0_i32, %c0_i32_0 : i32, i32
  }
  func.func @transform_2(%arg0: i32) -> (i32, i32) {
    %c0_i32 = arith.constant 0 : i32
    %c0_i32_0 = arith.constant 0 : i32
    %c0_i32_1 = arith.constant 0 : i32
    return %c0_i32, %c0_i32_0 : i32, i32
  }
  func.func @transform_3(%arg0: i32) -> (i32, i32) {
    %c0_i32 = arith.constant 0 : i32
    %c0_i32_0 = arith.constant 0 : i32
    %c0_i32_1 = arith.constant 0 : i32
    return %c0_i32, %c0_i32_0 : i32, i32
  }
  func.func @transform_4(%arg0: i32) -> (i32, i32) {
    %c0_i32 = arith.constant 0 : i32
    %c0_i32_0 = arith.constant 0 : i32
    %c0_i32_1 = arith.constant 0 : i32
    return %c0_i32, %c0_i32_0 : i32, i32
  }
  func.func @transform_5(%arg0: i32) -> (i32, i32) {
    %c0_i32 = arith.constant 0 : i32
    %c0_i32_0 = arith.constant 0 : i32
    %c0_i32_1 = arith.constant 0 : i32
    return %c0_i32, %c0_i32_0 : i32, i32
  }
  func.func @transform_6(%arg0: i32) -> (i32, i32) {
    %c0_i32 = arith.constant 0 : i32
    %c0_i32_0 = arith.constant 0 : i32
    %c0_i32_1 = arith.constant 0 : i32
    return %c0_i32, %c0_i32_0 : i32, i32
  }
  func.func @transform_7(%arg0: i32) -> (i32, i32) {
    %c0_i32 = arith.constant 0 : i32
    %c0_i32_0 = arith.constant 0 : i32
    %c0_i32_1 = arith.constant 0 : i32
    return %c0_i32, %c0_i32_0 : i32, i32
  }
  func.func @transform_8(%arg0: i32) -> (i32, i32) {
    %c0_i32 = arith.constant 0 : i32
    %c0_i32_0 = arith.constant 0 : i32
    %c0_i32_1 = arith.constant 0 : i32
    return %c0_i32, %c0_i32_0 : i32, i32
  }
  func.func @transform_9(%arg0: i32) -> (i32, i32) {
    %c0_i32 = arith.constant 0 : i32
    %c0_i32_0 = arith.constant 0 : i32
    %c0_i32_1 = arith.constant 0 : i32
    return %c0_i32, %c0_i32_0 : i32, i32
  }
  func.func @transform_10(%arg0: i32) -> (i32, i32) {
    %c0_i32 = arith.constant 0 : i32
    %c0_i32_0 = arith.constant 0 : i32
    %c0_i32_1 = arith.constant 0 : i32
    return %c0_i32, %c0_i32_0 : i32, i32
  }
  func.func @transform_11(%arg0: i32) -> (i32, i32) {
    %c0_i32 = arith.constant 0 : i32
    %c0_i32_0 = arith.constant 0 : i32
    return %c0_i32, %arg0 : i32, i32
  }
}

</mosaic_0001>

<bundles_post_ra>
// kernel: diag_gaussian_actor_forward.1
= control target key start
LH: loop header
LB: loop body
LE: loop exit
PB: predicated region body
PF: predicated region fallthrough
CT: control target
= control target key end

     0   :  { %vm81_vm0 = vcmask 1043456   ;;  %vm68_vm1 = vcmask 97280   ;;  %vm769_vm2 = vmmov 1   ;;  %v770_v2 = vmov 0   ;;  %s950_s0 = inlined_call_operand.vmem [shape: f32[12,2], index: 0, kind: input, shape index: {}]   ;;  %s951_s1 = inlined_call_operand.vmem [shape: f32[32,12], index: 1, kind: input, shape index: {}]   ;;  %s952_s2 = inlined_call_operand.vmem [shape: f32[32,1], index: 2, kind: input, shape index: {}]   ;;  %s953_s4 = inlined_call_operand.vmem [shape: f32[8,1], index: 4, kind: input, shape index: {}]   ;;  %s954_s6 = inlined_call_operand.vmem [shape: f32[32,1], index: 6, kind: input, shape index: {}]   ;;  %s955_s8 = inlined_call_operand.vmem [shape: f32[32,1], index: 8, kind: input, shape index: {}]   ;;  %s956_s10 = inlined_call_operand.vmem [shape: f32[16,1], index: 10, kind: input, shape index: {}]   ;;  %s957_s3 = inlined_call_operand.vmem [shape: f32[8,32], index: 3, kind: input, shape index: {}]   ;;  %s958_s5 = inlined_call_operand.vmem [shape: f32[32,8], index: 5, kind: input, shape index: {}]   ;;  %s959_s7 = inlined_call_operand.vmem [shape: f32[32,32], index: 7, kind: input, shape index: {}]   ;;  %s960_s9 = inlined_call_operand.vmem [shape: f32[16,32], index: 9, kind: input, shape index: {}]   ;;  %s961_s11 = inlined_call_operand.vmem [shape: f32[24,2], index: 11, kind: output, shape index: {}]  }
   0x1   :  { %v38_v0 = vld [vmem:[%s950_s0] sm:$0xff]  ;;  %v39_v1 = vld [vmem:[%s950_s0 + $0x8] sm:$0xf]  ;;  %vm729_vm3 = vmpackc.low %vm81_vm0, %vm769_vm2  ;;  %761 = vset.pattern.permute.xlu0 %v770_v2  ;;  %762 = vset.pattern.permute.xlu1 %v770_v2  ;;  %v771_v23 = vmov 0.0|0.0   ;;  %vm772_vm4 = vmmov 0   ;;  %v773_v24 = vmov 0.0  }
   0x2   :  { %v728_v3 = vpack.c.bf16 %v39_v1, %v38_v0  ;;  %v40_v4 = vld [vmem:[%s951_s1] sm:$0xff]  ;;  %v46_v6 = vld [vmem:[%s952_s2 + $0x10] sm:$0xff]  ;;  %v41_v7 = vld [vmem:[%s951_s1 + $0x8] sm:$0xff]  ;;  %734 = vmatprep.subr.bf16.mxu1 %v771_v23  ;;  %692 = vmatprep.mubr.msk.f32.mxu1 %vm772_vm4, %v773_v24  ;;  %vm181_vm5 = vcmask 261120   ;;  %vm260_vm6 = vcmask 64512  }
   0x3   :  { %678 = vmatprep.mubr.msk.f32.mxu0 %vm68_vm1, %v40_v4  ;;  %v44_v5 = vld [vmem:[%s952_s2] sm:$0xff]  ;;  %v45_v8 = vld [vmem:[%s952_s2 + $0x8] sm:$0xff]  ;;  %60 = vperm.xlu1 %762, %v46_v6   ;;  %v42_v9 = vld [vmem:[%s951_s1 + $0x10] sm:$0xff] }
   0x4   :  { %730 = vmatprep.subr.msk.bf16.mxu0 %vm729_vm3, %v728_v3  ;;  %50 = vperm.xlu0 %761, %v44_v5   ;;  %v47_v10 = vld [vmem:[%s952_s2 + $0x18] sm:$0xff]  ;;  %v175_v12 = vld [vmem:[%s953_s4] sm:$0xff]  ;;  %v363_v14 = vld [vmem:[%s954_s6 + $0x8] sm:$0xff] }
   0x5   :  { %733 = vmatpush3.bf16.msk.msra.mxu0 %vm729_vm3, %v728_v3  ;;  %v43_v11 = vld [vmem:[%s951_s1 + $0x18] sm:$0xff]  ;;  %v362_v13 = vld [vmem:[%s954_s6] sm:$0xff]  ;;  %v364_v15 = vld [vmem:[%s954_s6 + $0x10] sm:$0xff] }
   0x6   :  { %v365_v16 = vld [vmem:[%s954_s6 + $0x18] sm:$0xff]  ;;  %v394_v17 = vld [vmem:[%s955_s8] sm:$0xff]  ;;  %v395_v18 = vld [vmem:[%s955_s8 + $0x8] sm:$0xff] }
   0x7   :  { %65 = vperm.xlu1 %762, %v47_v10   ;;  %v396_v19 = vld [vmem:[%s955_s8 + $0x10] sm:$0xff]  ;;  %v397_v20 = vld [vmem:[%s955_s8 + $0x18] sm:$0xff]  ;;  %v522_v21 = vld [vmem:[%s956_s10 + $0x8] sm:$0xff] }
   0x8   :  { %679 = vmatmul.mubr.msk.f32.vlgmr.msra.gmra.mrb[0].mxu0 %vm68_vm1, %v41_v7  ;;  %55 = vperm.xlu0 %761, %v45_v8   ;;  %v521_v22 = vld [vmem:[%s956_s10] sm:$0xff]  ;;  %v257_v50 = vld [vmem:[%s958_s5 + $0x8] sm:$0xff]  ;;  %v258_v51 = vld [vmem:[%s958_s5 + $0x10] sm:$0xff] }
   0x9   :  { %681 = vmatprep.mubr.msk.f32.mxu0 %vm68_vm1, %v42_v9  ;;  %v174_v43 = vld [vmem:[%s957_s3] sm:$0xff]  ;;  %v259_v52 = vld [vmem:[%s958_s5 + $0x18] sm:$0xff]  ;;  %v391_v8 = vld [vmem:[%s959_s7 + $0x8] sm:$0xff] }
   0xa   :  { %v256_v44 = vld [vmem:[%s958_s5] sm:$0xff]  ;;  %v392_v9 = vld [vmem:[%s959_s7 + $0x10] sm:$0xff]  ;;  %v393_v10 = vld [vmem:[%s959_s7 + $0x18] sm:$0xff] }
   0xb   :  { %368 = vperm.xlu1 %762, %v362_v13   ;;  %v390_v53 = vld [vmem:[%s959_s7] sm:$0xff] }
   0xc   :  { %682 = vmatmul.mubr.msk.f32.gmra.mrb[2].mxu0 %vm68_vm1, %v43_v11  ;;  %178 = vperm.xlu0 %761, %v175_v12   ;;  %v519_v11 = vld [vmem:[%s960_s9] sm:$0xff] }
   0xd   :  { %697 = vmatprep.mubr.msk.f32.mxu0 %vm260_vm6, %v256_v44 }
   0xf   :  { %378 = vperm.xlu1 %762, %v364_v15  }
  0x10   :  { %373 = vperm.xlu0 %761, %v363_v14  }
  0x13   :  { %400 = vperm.xlu1 %762, %v394_v17  }
  0x14   :  { %383 = vperm.xlu0 %761, %v365_v16  }
  0x17   :  { %410 = vperm.xlu1 %762, %v396_v19  }
  0x18   :  { %405 = vperm.xlu0 %761, %v395_v18  }
  0x1b   :  { %530 = vperm.xlu1 %762, %v522_v21  }
  0x1c   :  { %415 = vperm.xlu0 %761, %v397_v20  }
  0x20   :  { %525 = vperm.xlu0 %761, %v521_v22  }
  0x82   :  { %v61_v26 = vpop.permute.xlu1 %60 }
  0x83   :  { %v51_v25 = vpop.permute.xlu0 %50 }
  0x86   :  { %v66_v33 = vpop.permute.xlu1 %65 }
  0x87   :  { %v56_v27 = vpop.permute.xlu0 %55 }
  0x8a   :  { %v369_v56 = vpop.permute.xlu1 %368 }
  0x8b   :  { %v179_v45 = vpop.permute.xlu0 %178 }
  0x8e   :  { %v379_v4 = vpop.permute.xlu1 %378 }
  0x8f   :  { %v374_v54 = vpop.permute.xlu0 %373 }
  0x92   :  { %v401_v13 = vpop.permute.xlu1 %400 }
  0x93   :  { %v384_v1 = vpop.permute.xlu0 %383 }
  0x96   :  { %v411_v22 = vpop.permute.xlu1 %410 }
  0x97   :  { %v406_v12 = vpop.permute.xlu0 %405 }
  0x9b   :  { %v416_v19 = vpop.permute.xlu0 %415 }
  0xdb   :  { %v680_v28 = vpop.f32.mrb[0].mxu0 }
  0xdc   :  { %v157_v29 = vadd.f32 %v680_v28, %v56_v27  ;;  %v151_v30 = vpop.f32.mrb[1].mxu0 }
  0xdd   :  { %v152_v31 = vadd.f32 %v151_v30, %v51_v25  ;;  %v520_v30 = vld [vmem:[%s960_s9 + $0x8] sm:$0xff] }
  0xde   :  { %v171_v32 = vmax.f32 %v157_v29, 0.0 }
  0xdf   :  { %v170_v34 = vmax.f32 %v152_v31, 0.0  ;;  %v683_v35 = vpop.f32.mrb[2].mxu0  ;;  %v531_v31 = vpop.permute.xlu1 %530 }
  0xe0   :  { %v167_v36 = vadd.f32 %v683_v35, %v66_v33  ;;  %v161_v37 = vpop.f32.mrb[3].mxu0  ;;  %v526_v33 = vpop.permute.xlu0 %525 }
  0xe1   :  { %v162_v38 = vadd.f32 %v161_v37, %v61_v26  ;;  %v735_v39 = vpack.c.bf16 %v171_v32, %v170_v34 }
  0xe2   :  { %v173_v40 = vmax.f32 %v167_v36, 0.0 }
  0xe3   :  { %v172_v41 = vmax.f32 %v162_v38, 0.0  ;;  %736 = vmatpush3.bf16.msra.mxu1 %v735_v39 }
  0xe4   :  { %737 = vmatprep.subr.bf16.mxu1 %v771_v23 }
  0xe5   :  { %v738_v42 = vpack.c.bf16 %v173_v40, %v172_v41 }
  0xe7   :  { %739 = vmatpush3.bf16.msra.mxu1 %v738_v42 }
  0xea   :  { %693 = vmatmul.mubr.msk.f32.vlgmr.msra.gmra.mrb[0].mxu1 %vm181_vm5, %v174_v43 }
  0xeb   :  { %711 = vmatprep.mubr.msk.f32.mxu1 %vm181_vm5, %v390_v53 }
 0x1bd   :  { %v251_v46 = vpop.f32.mrb[0].mxu1 }
 0x1be   :  { %v252_v47 = vadd.f32 %v251_v46, %v179_v45  ;;  %v694_v48 = vpop.f32.mrb[1].mxu1 }
 0x1c0   :  { %v255_v49 = vmax.f32 %v252_v47, 0.0 }
 0x1c2   :  { %695 = vmatprep.subr.mxu0 %v255_v49 }
 0x1c3   :  { %696 = vmatpush3.msra.mxu0 %v255_v49 }
 0x1c4   :  { %698 = vmatmul.mubr.msk.f32.vlgmr.msra.gmra.mrb[4].mxu0 %vm260_vm6, %v257_v50 }
 0x1c5   :  { %700 = vmatprep.mubr.msk.f32.mxu0 %vm260_vm6, %v258_v51 }
 0x1c8   :  { %701 = vmatmul.mubr.msk.f32.gmra.mrb[6].mxu0 %vm260_vm6, %v259_v52 }
 0x1c9   :  { %725 = vmatprep.mubr.msk.f32.mxu0 %vm181_vm5, %v519_v11 }
 0x297   :  { %v699_v55 = vpop.f32.mrb[4].mxu0 }
 0x298   :  { %v359_v57 = vadd.f32 %v699_v55, %v171_v32  ;;  %v339_v58 = vpop.f32.mrb[5].mxu0 }
 0x299   :  { %v358_v59 = vadd.f32 %v339_v58, %v170_v34 }
 0x29a   :  { %v387_v60 = vadd.f32 %v374_v54, %v359_v57 }
 0x29b   :  { %v386_v61 = vadd.f32 %v369_v56, %v358_v59  ;;  %v702_v62 = vpop.f32.mrb[6].mxu0 }
 0x29c   :  { %v361_v63 = vadd.f32 %v702_v62, %v173_v40  ;;  %v349_v0 = vpop.f32.mrb[7].mxu0 }
 0x29d   :  { %v360_v2 = vadd.f32 %v349_v0, %v172_v41  ;;  %v740_v3 = vpack.c.bf16 %v387_v60, %v386_v61 }
 0x29e   :  { %v389_v5 = vadd.f32 %v384_v1, %v361_v63 }
 0x29f   :  { %v388_v6 = vadd.f32 %v379_v4, %v360_v2  ;;  %741 = vmatprep.subr.bf16.mxu1 %v740_v3 }
 0x2a0   :  { %743 = vmatpush3.bf16.msra.mxu1 %v740_v3 }
 0x2a1   :  { %v744_v7 = vpack.c.bf16 %v389_v5, %v388_v6 }
 0x2a3   :  { %745 = vmatprep.subr.bf16.mxu1 %v744_v7 }
 0x2a4   :  { %747 = vmatpush3.bf16.msra.mxu1 %v744_v7 }
 0x2a7   :  { %712 = vmatmul.mubr.msk.f32.vlgmr.msra.gmra.mrb[2].mxu1 %vm181_vm5, %v391_v8 }
 0x2a8   :  { %714 = vmatprep.mubr.msk.f32.mxu1 %vm181_vm5, %v392_v9 }
 0x2ab   :  { %715 = vmatmul.mubr.msk.f32.gmra.mrb[4].mxu1 %vm181_vm5, %v393_v10 }
 0x37a   :  { %v713_v14 = vpop.f32.mrb[2].mxu1 }
 0x37b   :  { %v502_v15 = vadd.f32 %v713_v14, %v406_v12  ;;  %v496_v16 = vpop.f32.mrb[3].mxu1 }
 0x37c   :  { %v497_v17 = vadd.f32 %v496_v16, %v401_v13 }
 0x37d   :  { %v516_v18 = vmax.f32 %v502_v15, 0.0 }
 0x37e   :  { %v515_v20 = vmax.f32 %v497_v17, 0.0  ;;  %v716_v21 = vpop.f32.mrb[4].mxu1 }
 0x37f   :  { %v512_v23 = vadd.f32 %v716_v21, %v416_v19  ;;  %v506_v24 = vpop.f32.mrb[5].mxu1 }
 0x380   :  { %v748_v25 = vpack.c.bf16 %v516_v18, %v515_v20  ;;  %v507_v26 = vadd.f32 %v506_v24, %v411_v22 }
 0x381   :  { %v518_v27 = vmax.f32 %v512_v23, 0.0 }
 0x382   :  { %v517_v28 = vmax.f32 %v507_v26, 0.0  ;;  %749 = vmatprep.subr.bf16.mxu0 %v748_v25 }
 0x383   :  { %751 = vmatpush3.bf16.msra.mxu0 %v748_v25 }
 0x384   :  { %v752_v29 = vpack.c.bf16 %v518_v27, %v517_v28 }
 0x386   :  { %753 = vmatprep.subr.bf16.mxu0 %v752_v29 }
 0x387   :  { %755 = vmatpush3.bf16.msra.mxu0 %v752_v29 }
 0x38a   :  { %726 = vmatmul.mubr.msk.f32.vlgmr.msra.gmra.mrb[8].mxu0 %vm181_vm5, %v520_v30 }
 0x45d   :  { %v727_v32 = vpop.f32.mrb[8].mxu0 }
 0x45e   :  { %v611_v34 = vadd.f32 %v727_v32, %v531_v31  ;;  %v605_v35 = vpop.f32.mrb[9].mxu0 }
 0x45f   :  { %v606_v36 = vadd.f32 %v605_v35, %v526_v33 }
 0x460   :  { %763 = vtanh.f32 %v611_v34 }
 0x461   :  { %618 = vst [vmem:[%s961_s11] sm:$0xff] %v606_v36  ;;  %765 = vtanh.f32 %v606_v36 }
 0x46a   :  { %v764_v37 = vpop.eup %763 }
 0x46b   :  { %v766_v38 = vpop.eup %765  ;;  %v615_v39 = vadd.f32 1.0, %v764_v37 }
 0x46c   :  { %623 = vst [vmem:[%s961_s11 + $0x10] sm:$0xff] %v766_v38 }
 0x46d   :  { %v616_v40 = vmul.f32 3.5, %v615_v39 }
 0x46f   :  { %v617_v41 = vadd.f32 -5.0, %v616_v40 }
 0x471   :  { %v619_v42 = vmul.f32 1.442695, %v617_v41 }
 0x473   :  { %767 = vpow2.f32 %v619_v42 }
 0x47d   :  { %v768_v43 = vpop.eup %767 }
 0x47e   :  { %621 = vst [vmem:[%s961_s11 + $0x8] sm:$0xff] %v768_v43 }

</bundles_post_ra>
